<compile_context>
chip_gen: v7x
topology: tpu7x:2x2x1
jax: 0.10.0
libtpu: 0.0.40
codegen_flags: <defaults>
</compile_context>

<pallas_src>
import functools

import numpy as np
import jax
import jax.numpy as jnp
from jax.experimental import pallas as pl
from jax.experimental.pallas import tpu as pltpu

_LANES = 128


def _edges(bins):
    # Matches torch: arange(bins+1).float()/bins, last edge += 1e-6 (all float32).
    e = np.arange(bins + 1, dtype=np.float32) / np.float32(bins)
    e[-1] += np.float32(1e-6)
    return e


def _bin_index(pred_f32, lw_f32, bins):
    """Per-element bin index; equals `bins` for invalid / out-of-range elements."""
    g = jnp.abs(jnp.exp(-pred_f32) - 1.0)
    valid = lw_f32 > 0.0
    edges = _edges(bins)
    idx = jnp.zeros(pred_f32.shape, dtype=jnp.int32)
    # g >= edges[0] == 0 always holds, so start from edge 1.  `idx == i` is then
    # exactly (g >= edges[i]) & (g < edges[i+1]) from the torch loop.
    for i in range(1, bins + 1):
        idx = idx + (g >= edges[i]).astype(jnp.int32)
    idx = jnp.where(valid, idx, bins)  # invalid elements never match a bin
    return idx, valid


def _ghmc_hist_kernel(pred_ref, lw_ref, hist_ref, *, bins):
    """Pass 1: per-lane partial histogram of bin indices (+ valid count)."""
    idx, valid = _bin_index(pred_ref[...].astype(jnp.float32),
                            lw_ref[...].astype(jnp.float32), bins)
    hist_ref[...] = jnp.zeros_like(hist_ref)
    # Sublane (axis 0) reduces only; lane/tile reduction is done in the wrapper.
    for i in range(bins):
        hist_ref[i, :] = jnp.sum((idx == i).astype(jnp.int32), axis=0)
    hist_ref[bins, :] = jnp.sum(valid.astype(jnp.int32), axis=0)


def _ghmc_apply_kernel(bw_ref, pred_ref, lw_ref, out_ref, *, bins):
    """Pass 2: out = pred * bin_weight[bin_index] (0 for invalid / out-of-range)."""
    pred = pred_ref[...].astype(jnp.float32)
    idx, _ = _bin_index(pred, lw_ref[...].astype(jnp.float32), bins)
    weights = jnp.zeros_like(pred)
    for i in range(bins):  # one int compare + one select per bin
        weights = jnp.where(idx == i, bw_ref[i], weights)
    out_ref[...] = (weights * pred).astype(out_ref.dtype)


def ghmc_loss(pred, target, label_weight, *, bins=10, momentum=0.0,
              loss_weight=1.0, tile_rows=512):
    """Pallas GHMC forward. pred/target/label_weight: [B, C] float arrays."""
    del target       # only used via ones_like in the equal-dim torch branch
    del loss_weight  # the torch forward does not apply it to the returned loss
    # TODO(synk): momentum > 0 needs the persistent acc_sum buffer (module state);
    # only the default momentum=0 path is implemented.
    assert momentum == 0.0
    assert bins >= 1

    orig_shape = pred.shape
    out_dtype = pred.dtype
    n = int(pred.size)

    hist_rows = max(8, -(-(bins + 1) // 8) * 8)   # sublane-aligned, >= bins + 1

    # ---- lane-dense layout: flatten, pad, and view as [rows, 128] -------------
    rows = -(-n // _LANES)
    rows = -(-rows // 8) * 8
    if rows > tile_rows:
        rows = -(-rows // tile_rows) * tile_rows
        tr = tile_rows
    else:
        tr = rows
    padded = rows * _LANES
    num_tiles = rows // tr

    def to_lane_dense(x):
        x = jnp.ravel(x).astype(jnp.float32)
        x = jnp.pad(x, (0, padded - n))   # padded tail: pred=0, label_weight=0 (invalid)
        return x.reshape(rows, _LANES)

    pred2 = to_lane_dense(pred)
    lw2 = to_lane_dense(label_weight)

    # ---- pass 1: per-tile partial histograms -----------------------------------
    hist = pl.pallas_call(
        functools.partial(_ghmc_hist_kernel, bins=bins),
        out_shape=jax.ShapeDtypeStruct((num_tiles * hist_rows, _LANES), jnp.int32),
        grid=(num_tiles,),
        in_specs=[
            pl.BlockSpec((tr, _LANES), lambda t: (t, 0)),
            pl.BlockSpec((tr, _LANES), lambda t: (t, 0)),
        ],
        out_specs=pl.BlockSpec((hist_rows, _LANES), lambda t: (t, 0)),
        compiler_params=pltpu.CompilerParams(dimension_semantics=("parallel",)),
    )(pred2, lw2)

    # ---- tiny global reduction + per-bin weights (plain JAX) -------------------
    totals = jnp.sum(hist.reshape(num_tiles, hist_rows, _LANES), axis=(0, 2))
    counts = totals[:bins].astype(jnp.float32)               # elements per bin
    tot = jnp.maximum(totals[bins].astype(jnp.float32), 1.0)  # valid element count
    nonempty = counts > 0.0
    n_bins = jnp.sum(nonempty.astype(jnp.float32))
    inv_n = 1.0 / jnp.maximum(n_bins, 1.0)   # if no bin is non-empty, weights are 0 anyway
    bin_w = jnp.where(nonempty, tot / jnp.maximum(counts, 1.0), 0.0) * inv_n

    # ---- pass 2: elementwise apply (both TCs on v7x via "parallel") ------------
    out2 = pl.pallas_call(
        functools.partial(_ghmc_apply_kernel, bins=bins),
        out_shape=jax.ShapeDtypeStruct((rows, _LANES), out_dtype),
        grid=(num_tiles,),
        in_specs=[
            pl.BlockSpec(memory_space=pltpu.MemorySpace.SMEM),   # per-bin weights
            pl.BlockSpec((tr, _LANES), lambda t: (t, 0)),
            pl.BlockSpec((tr, _LANES), lambda t: (t, 0)),
        ],
        out_specs=pl.BlockSpec((tr, _LANES), lambda t: (t, 0)),
        compiler_params=pltpu.CompilerParams(dimension_semantics=("parallel",)),
    )(bin_w, pred2, lw2)

    return out2.reshape(-1)[:n].reshape(orig_shape)


def _ghmc_ref(pred, label_weight, bins=10):
    """Pure-JAX reference mirroring the torch forward (momentum=0)."""
    pred = pred.astype(jnp.float32)
    lw = label_weight.astype(jnp.float32)
    edges = _edges(bins)
    g = jnp.abs(jnp.exp(-pred) - 1.0)
    valid = lw > 0.0
    tot = jnp.maximum(jnp.sum(valid.astype(jnp.float32)), 1.0)
    weights = jnp.zeros_like(pred)
    nn = jnp.float32(0.0)
    for i in range(bins):
        inds = (g >= edges[i]) & (g < edges[i + 1]) & valid
        num = jnp.sum(inds.astype(jnp.float32))
        has = num > 0.0
        w = jnp.where(has, tot / jnp.maximum(num, 1.0), 0.0)
        weights = jnp.where(inds, w, weights)
        nn = nn + jnp.where(has, 1.0, 0.0)
    weights = jnp.where(nn > 0.0, weights / jnp.maximum(nn, 1.0), weights)
    return weights * pred


if __name__ == "__main__":
    # Small [batch, class] case matching the module's forward signature.
    k1, k2, k3 = jax.random.split(jax.random.PRNGKey(0), 3)
    B, C = 16, 32
    pred = jax.random.normal(k1, (B, C), dtype=jnp.float32) * 2.0
    target = (jax.random.uniform(k2, (B, C)) > 0.7).astype(jnp.float32)        # unused by this branch
    label_weight = (jax.random.uniform(k3, (B, C)) > 0.2).astype(jnp.float32)  # 1 valid, 0 ignored

    loss = jax.block_until_ready(ghmc_loss(pred, target, label_weight, bins=10, momentum=0.0))
    ref = _ghmc_ref(pred, label_weight, bins=10)
    assert loss.shape == (B, C)
    assert jnp.allclose(loss, ref, rtol=1e-5, atol=1e-5), (
        f"mismatch: max abs diff {jnp.max(jnp.abs(loss - ref))}")

    # Larger case that exercises the multi-tile (grid > 1) path.
    k4, k5, k6 = jax.random.split(jax.random.PRNGKey(1), 3)
    B2, C2 = 128, 600   # 76800 elements -> 2 row tiles of 512x128
    pred_b = jax.random.normal(k4, (B2, C2), dtype=jnp.float32) * 2.0
    target_b = (jax.random.uniform(k5, (B2, C2)) > 0.7).astype(jnp.float32)
    lw_b = (jax.random.uniform(k6, (B2, C2)) > 0.2).astype(jnp.float32)

    loss_b = jax.block_until_ready(ghmc_loss(pred_b, target_b, lw_b, bins=10, momentum=0.0))
    ref_b = _ghmc_ref(pred_b, lw_b, bins=10)
    assert jnp.allclose(loss_b, ref_b, rtol=1e-5, atol=1e-5), (
        f"mismatch (tiled): max abs diff {jnp.max(jnp.abs(loss_b - ref_b))}")

    print("KERNEL_OK")
</pallas_src>

<mosaic_0001>
module attributes {stable_mosaic.version = 11 : i64} {
  func.func @_ghmc_hist_kernel(%arg0: i32, %arg1: memref<8x128xf32, #tpu.memory_space<vmem>>, %arg2: memref<8x128xf32, #tpu.memory_space<vmem>>, %arg3: memref<16x128xi32, #tpu.memory_space<vmem>>) attributes {dimension_semantics = [#tpu.dimension_semantics<parallel>], iteration_bounds = array<i64: 1>, scalar_prefetch = 0 : i64, scratch_operands = 0 : i64, tpu.core_type = #tpu.core_type<tc>, window_params = [{transform_indices = @transform_0, window_bounds = array<i64: 8, 128>}, {transform_indices = @transform_1, window_bounds = array<i64: 8, 128>}, {transform_indices = @transform_2, window_bounds = array<i64: 16, 128>}]} {
    %c0 = arith.constant 0 : index
    %c0_0 = arith.constant 0 : index
    %0 = vector.load %arg1[%c0, %c0_0] : memref<8x128xf32, #tpu.memory_space<vmem>>, vector<8x128xf32>
    %c0_1 = arith.constant 0 : index
    %c0_2 = arith.constant 0 : index
    %1 = vector.load %arg2[%c0_1, %c0_2] : memref<8x128xf32, #tpu.memory_space<vmem>>, vector<8x128xf32>
    %cst = arith.constant 0.000000e+00 : f32
    %2 = vector.broadcast %cst : f32 to vector<8x128xf32>
    %3 = arith.subf %2, %0 : vector<8x128xf32>
    %4 = math.exp %3 : vector<8x128xf32>
    %cst_3 = arith.constant 1.000000e+00 : f32
    %5 = vector.broadcast %cst_3 : f32 to vector<8x128xf32>
    %6 = arith.subf %4, %5 : vector<8x128xf32>
    %7 = math.absf %6 : vector<8x128xf32>
    %cst_4 = arith.constant 0.000000e+00 : f32
    %8 = vector.broadcast %cst_4 : f32 to vector<8x128xf32>
    %9 = arith.cmpf ogt, %1, %8 : vector<8x128xf32>
    %c0_i32 = arith.constant 0 : i32
    %10 = vector.broadcast %c0_i32 : i32 to vector<8x128xi32>
    %cst_5 = arith.constant 1.000000e-01 : f32
    %11 = vector.broadcast %cst_5 : f32 to vector<8x128xf32>
    %12 = arith.cmpf oge, %7, %11 : vector<8x128xf32>
    %13 = arith.extui %12 : vector<8x128xi1> to vector<8x128xi32>
    %14 = arith.addi %10, %13 : vector<8x128xi32>
    %cst_6 = arith.constant 2.000000e-01 : f32
    %15 = vector.broadcast %cst_6 : f32 to vector<8x128xf32>
    %16 = arith.cmpf oge, %7, %15 : vector<8x128xf32>
    %17 = arith.extui %16 : vector<8x128xi1> to vector<8x128xi32>
    %18 = arith.addi %14, %17 : vector<8x128xi32>
    %cst_7 = arith.constant 3.000000e-01 : f32
    %19 = vector.broadcast %cst_7 : f32 to vector<8x128xf32>
    %20 = arith.cmpf oge, %7, %19 : vector<8x128xf32>
    %21 = arith.extui %20 : vector<8x128xi1> to vector<8x128xi32>
    %22 = arith.addi %18, %21 : vector<8x128xi32>
    %cst_8 = arith.constant 4.000000e-01 : f32
    %23 = vector.broadcast %cst_8 : f32 to vector<8x128xf32>
    %24 = arith.cmpf oge, %7, %23 : vector<8x128xf32>
    %25 = arith.extui %24 : vector<8x128xi1> to vector<8x128xi32>
    %26 = arith.addi %22, %25 : vector<8x128xi32>
    %cst_9 = arith.constant 5.000000e-01 : f32
    %27 = vector.broadcast %cst_9 : f32 to vector<8x128xf32>
    %28 = arith.cmpf oge, %7, %27 : vector<8x128xf32>
    %29 = arith.extui %28 : vector<8x128xi1> to vector<8x128xi32>
    %30 = arith.addi %26, %29 : vector<8x128xi32>
    %cst_10 = arith.constant 6.000000e-01 : f32
    %31 = vector.broadcast %cst_10 : f32 to vector<8x128xf32>
    %32 = arith.cmpf oge, %7, %31 : vector<8x128xf32>
    %33 = arith.extui %32 : vector<8x128xi1> to vector<8x128xi32>
    %34 = arith.addi %30, %33 : vector<8x128xi32>
    %cst_11 = arith.constant 0.699999988 : f32
    %35 = vector.broadcast %cst_11 : f32 to vector<8x128xf32>
    %36 = arith.cmpf oge, %7, %35 : vector<8x128xf32>
    %37 = arith.extui %36 : vector<8x128xi1> to vector<8x128xi32>
    %38 = arith.addi %34, %37 : vector<8x128xi32>
    %cst_12 = arith.constant 8.000000e-01 : f32
    %39 = vector.broadcast %cst_12 : f32 to vector<8x128xf32>
    %40 = arith.cmpf oge, %7, %39 : vector<8x128xf32>
    %41 = arith.extui %40 : vector<8x128xi1> to vector<8x128xi32>
    %42 = arith.addi %38, %41 : vector<8x128xi32>
    %cst_13 = arith.constant 0.899999976 : f32
    %43 = vector.broadcast %cst_13 : f32 to vector<8x128xf32>
    %44 = arith.cmpf oge, %7, %43 : vector<8x128xf32>
    %45 = arith.extui %44 : vector<8x128xi1> to vector<8x128xi32>
    %46 = arith.addi %42, %45 : vector<8x128xi32>
    %cst_14 = arith.constant 1.00000095 : f32
    %47 = vector.broadcast %cst_14 : f32 to vector<8x128xf32>
    %48 = arith.cmpf oge, %7, %47 : vector<8x128xf32>
    %49 = arith.extui %48 : vector<8x128xi1> to vector<8x128xi32>
    %50 = arith.addi %46, %49 : vector<8x128xi32>
    %c10_i32 = arith.constant 10 : i32
    %51 = vector.broadcast %c10_i32 : i32 to vector<8x128xi32>
    %52 = arith.select %9, %50, %51 : vector<8x128xi1>, vector<8x128xi32>
    %c0_i32_15 = arith.constant 0 : i32
    %53 = vector.broadcast %c0_i32_15 : i32 to vector<16x128xi32>
    %c0_16 = arith.constant 0 : index
    %c0_17 = arith.constant 0 : index
    %54 = vector.load %arg3[%c0_16, %c0_17] : memref<16x128xi32, #tpu.memory_space<vmem>>, vector<16x128xi32>
    tpu.vector_store %arg3[%c0_16, %c0_17], %53 {strides = array<i32>} : memref<16x128xi32, #tpu.memory_space<vmem>>, vector<16x128xi32>,
    %c0_i32_18 = arith.constant 0 : i32
    %55 = vector.broadcast %c0_i32_18 : i32 to vector<8x128xi32>
    %56 = arith.cmpi eq, %52, %55 : vector<8x128xi32>
    %57 = arith.extui %56 : vector<8x128xi1> to vector<8x128xi32>
    %cst_19 = arith.constant dense<0> : vector<128xi32>
    %58 = vector.multi_reduction <add>, %57, %cst_19 [0] : vector<8x128xi32> to vector<128xi32>
    %c0_20 = arith.constant 0 : index
    %c0_21 = arith.constant 0 : index
    %59 = vector.load %arg3[%c0_20, %c0_21] : memref<16x128xi32, #tpu.memory_space<vmem>>, vector<1x128xi32>
    %60 = vector.shape_cast %59 : vector<1x128xi32> to vector<128xi32>
    %61 = vector.shape_cast %58 : vector<128xi32> to vector<1x128xi32>
    tpu.vector_store %arg3[%c0_20, %c0_21], %61 {strides = array<i32>} : memref<16x128xi32, #tpu.memory_space<vmem>>, vector<1x128xi32>,
    %c1_i32 = arith.constant 1 : i32
    %62 = vector.broadcast %c1_i32 : i32 to vector<8x128xi32>
    %63 = arith.cmpi eq, %52, %62 : vector<8x128xi32>
    %64 = arith.extui %63 : vector<8x128xi1> to vector<8x128xi32>
    %cst_22 = arith.constant dense<0> : vector<128xi32>
    %65 = vector.multi_reduction <add>, %64, %cst_22 [0] : vector<8x128xi32> to vector<128xi32>
    %c1 = arith.constant 1 : index
    %c0_23 = arith.constant 0 : index
    %66 = vector.load %arg3[%c1, %c0_23] : memref<16x128xi32, #tpu.memory_space<vmem>>, vector<1x128xi32>
    %67 = vector.shape_cast %66 : vector<1x128xi32> to vector<128xi32>
    %68 = vector.shape_cast %65 : vector<128xi32> to vector<1x128xi32>
    tpu.vector_store %arg3[%c1, %c0_23], %68 {strides = array<i32>} : memref<16x128xi32, #tpu.memory_space<vmem>>, vector<1x128xi32>,
    %c2_i32 = arith.constant 2 : i32
    %69 = vector.broadcast %c2_i32 : i32 to vector<8x128xi32>
    %70 = arith.cmpi eq, %52, %69 : vector<8x128xi32>
    %71 = arith.extui %70 : vector<8x128xi1> to vector<8x128xi32>
    %cst_24 = arith.constant dense<0> : vector<128xi32>
    %72 = vector.multi_reduction <add>, %71, %cst_24 [0] : vector<8x128xi32> to vector<128xi32>
    %c2 = arith.constant 2 : index
    %c0_25 = arith.constant 0 : index
    %73 = vector.load %arg3[%c2, %c0_25] : memref<16x128xi32, #tpu.memory_space<vmem>>, vector<1x128xi32>
    %74 = vector.shape_cast %73 : vector<1x128xi32> to vector<128xi32>
    %75 = vector.shape_cast %72 : vector<128xi32> to vector<1x128xi32>
    tpu.vector_store %arg3[%c2, %c0_25], %75 {strides = array<i32>} : memref<16x128xi32, #tpu.memory_space<vmem>>, vector<1x128xi32>,
    %c3_i32 = arith.constant 3 : i32
    %76 = vector.broadcast %c3_i32 : i32 to vector<8x128xi32>
    %77 = arith.cmpi eq, %52, %76 : vector<8x128xi32>
    %78 = arith.extui %77 : vector<8x128xi1> to vector<8x128xi32>
    %cst_26 = arith.constant dense<0> : vector<128xi32>
    %79 = vector.multi_reduction <add>, %78, %cst_26 [0] : vector<8x128xi32> to vector<128xi32>
    %c3 = arith.constant 3 : index
    %c0_27 = arith.constant 0 : index
    %80 = vector.load %arg3[%c3, %c0_27] : memref<16x128xi32, #tpu.memory_space<vmem>>, vector<1x128xi32>
    %81 = vector.shape_cast %80 : vector<1x128xi32> to vector<128xi32>
    %82 = vector.shape_cast %79 : vector<128xi32> to vector<1x128xi32>
    tpu.vector_store %arg3[%c3, %c0_27], %82 {strides = array<i32>} : memref<16x128xi32, #tpu.memory_space<vmem>>, vector<1x128xi32>,
    %c4_i32 = arith.constant 4 : i32
    %83 = vector.broadcast %c4_i32 : i32 to vector<8x128xi32>
    %84 = arith.cmpi eq, %52, %83 : vector<8x128xi32>
    %85 = arith.extui %84 : vector<8x128xi1> to vector<8x128xi32>
    %cst_28 = arith.constant dense<0> : vector<128xi32>
    %86 = vector.multi_reduction <add>, %85, %cst_28 [0] : vector<8x128xi32> to vector<128xi32>
    %c4 = arith.constant 4 : index
    %c0_29 = arith.constant 0 : index
    %87 = vector.load %arg3[%c4, %c0_29] : memref<16x128xi32, #tpu.memory_space<vmem>>, vector<1x128xi32>
    %88 = vector.shape_cast %87 : vector<1x128xi32> to vector<128xi32>
    %89 = vector.shape_cast %86 : vector<128xi32> to vector<1x128xi32>
    tpu.vector_store %arg3[%c4, %c0_29], %89 {strides = array<i32>} : memref<16x128xi32, #tpu.memory_space<vmem>>, vector<1x128xi32>,
    %c5_i32 = arith.constant 5 : i32
    %90 = vector.broadcast %c5_i32 : i32 to vector<8x128xi32>
    %91 = arith.cmpi eq, %52, %90 : vector<8x128xi32>
    %92 = arith.extui %91 : vector<8x128xi1> to vector<8x128xi32>
    %cst_30 = arith.constant dense<0> : vector<128xi32>
    %93 = vector.multi_reduction <add>, %92, %cst_30 [0] : vector<8x128xi32> to vector<128xi32>
    %c5 = arith.constant 5 : index
    %c0_31 = arith.constant 0 : index
    %94 = vector.load %arg3[%c5, %c0_31] : memref<16x128xi32, #tpu.memory_space<vmem>>, vector<1x128xi32>
    %95 = vector.shape_cast %94 : vector<1x128xi32> to vector<128xi32>
    %96 = vector.shape_cast %93 : vector<128xi32> to vector<1x128xi32>
    tpu.vector_store %arg3[%c5, %c0_31], %96 {strides = array<i32>} : memref<16x128xi32, #tpu.memory_space<vmem>>, vector<1x128xi32>,
    %c6_i32 = arith.constant 6 : i32
    %97 = vector.broadcast %c6_i32 : i32 to vector<8x128xi32>
    %98 = arith.cmpi eq, %52, %97 : vector<8x128xi32>
    %99 = arith.extui %98 : vector<8x128xi1> to vector<8x128xi32>
    %cst_32 = arith.constant dense<0> : vector<128xi32>
    %100 = vector.multi_reduction <add>, %99, %cst_32 [0] : vector<8x128xi32> to vector<128xi32>
    %c6 = arith.constant 6 : index
    %c0_33 = arith.constant 0 : index
    %101 = vector.load %arg3[%c6, %c0_33] : memref<16x128xi32, #tpu.memory_space<vmem>>, vector<1x128xi32>
    %102 = vector.shape_cast %101 : vector<1x128xi32> to vector<128xi32>
    %103 = vector.shape_cast %100 : vector<128xi32> to vector<1x128xi32>
    tpu.vector_store %arg3[%c6, %c0_33], %103 {strides = array<i32>} : memref<16x128xi32, #tpu.memory_space<vmem>>, vector<1x128xi32>,
    %c7_i32 = arith.constant 7 : i32
    %104 = vector.broadcast %c7_i32 : i32 to vector<8x128xi32>
    %105 = arith.cmpi eq, %52, %104 : vector<8x128xi32>
    %106 = arith.extui %105 : vector<8x128xi1> to vector<8x128xi32>
    %cst_34 = arith.constant dense<0> : vector<128xi32>
    %107 = vector.multi_reduction <add>, %106, %cst_34 [0] : vector<8x128xi32> to vector<128xi32>
    %c7 = arith.constant 7 : index
    %c0_35 = arith.constant 0 : index
    %108 = vector.load %arg3[%c7, %c0_35] : memref<16x128xi32, #tpu.memory_space<vmem>>, vector<1x128xi32>
    %109 = vector.shape_cast %108 : vector<1x128xi32> to vector<128xi32>
    %110 = vector.shape_cast %107 : vector<128xi32> to vector<1x128xi32>
    tpu.vector_store %arg3[%c7, %c0_35], %110 {strides = array<i32>} : memref<16x128xi32, #tpu.memory_space<vmem>>, vector<1x128xi32>,
    %c8_i32 = arith.constant 8 : i32
    %111 = vector.broadcast %c8_i32 : i32 to vector<8x128xi32>
    %112 = arith.cmpi eq, %52, %111 : vector<8x128xi32>
    %113 = arith.extui %112 : vector<8x128xi1> to vector<8x128xi32>
    %cst_36 = arith.constant dense<0> : vector<128xi32>
    %114 = vector.multi_reduction <add>, %113, %cst_36 [0] : vector<8x128xi32> to vector<128xi32>
    %c8 = arith.constant 8 : index
    %c0_37 = arith.constant 0 : index
    %115 = vector.load %arg3[%c8, %c0_37] : memref<16x128xi32, #tpu.memory_space<vmem>>, vector<1x128xi32>
    %116 = vector.shape_cast %115 : vector<1x128xi32> to vector<128xi32>
    %117 = vector.shape_cast %114 : vector<128xi32> to vector<1x128xi32>
    tpu.vector_store %arg3[%c8, %c0_37], %117 {strides = array<i32>} : memref<16x128xi32, #tpu.memory_space<vmem>>, vector<1x128xi32>,
    %c9_i32 = arith.constant 9 : i32
    %118 = vector.broadcast %c9_i32 : i32 to vector<8x128xi32>
    %119 = arith.cmpi eq, %52, %118 : vector<8x128xi32>
    %120 = arith.extui %119 : vector<8x128xi1> to vector<8x128xi32>
    %cst_38 = arith.constant dense<0> : vector<128xi32>
    %121 = vector.multi_reduction <add>, %120, %cst_38 [0] : vector<8x128xi32> to vector<128xi32>
    %c9 = arith.constant 9 : index
    %c0_39 = arith.constant 0 : index
    %122 = vector.load %arg3[%c9, %c0_39] : memref<16x128xi32, #tpu.memory_space<vmem>>, vector<1x128xi32>
    %123 = vector.shape_cast %122 : vector<1x128xi32> to vector<128xi32>
    %124 = vector.shape_cast %121 : vector<128xi32> to vector<1x128xi32>
    tpu.vector_store %arg3[%c9, %c0_39], %124 {strides = array<i32>} : memref<16x128xi32, #tpu.memory_space<vmem>>, vector<1x128xi32>,
    %125 = arith.extui %9 : vector<8x128xi1> to vector<8x128xi32>
    %cst_40 = arith.constant dense<0> : vector<128xi32>
    %126 = vector.multi_reduction <add>, %125, %cst_40 [0] : vector<8x128xi32> to vector<128xi32>
    %c10 = arith.constant 10 : index
    %c0_41 = arith.constant 0 : index
    %127 = vector.load %arg3[%c10, %c0_41] : memref<16x128xi32, #tpu.memory_space<vmem>>, vector<1x128xi32>
    %128 = vector.shape_cast %127 : vector<1x128xi32> to vector<128xi32>
    %129 = vector.shape_cast %126 : vector<128xi32> to vector<1x128xi32>
    tpu.vector_store %arg3[%c10, %c0_41], %129 {strides = array<i32>} : memref<16x128xi32, #tpu.memory_space<vmem>>, vector<1x128xi32>,
    return
  }
  func.func @transform_0(%arg0: i32) -> (i32, i32) {
    %c0_i32 = arith.constant 0 : i32
    %c0_i32_0 = arith.constant 0 : i32
    return %arg0, %c0_i32 : i32, i32
  }
  func.func @transform_1(%arg0: i32) -> (i32, i32) {
    %c0_i32 = arith.constant 0 : i32
    %c0_i32_0 = arith.constant 0 : i32
    return %arg0, %c0_i32 : i32, i32
  }
  func.func @transform_2(%arg0: i32) -> (i32, i32) {
    %c0_i32 = arith.constant 0 : i32
    %c0_i32_0 = arith.constant 0 : i32
    return %arg0, %c0_i32 : i32, i32
  }
}

</mosaic_0001>

<bundles_post_ra>
// kernel: tpu_custom_call.1
= control target key start
LH: loop header
LB: loop body
LE: loop exit
PB: predicated region body
PF: predicated region fallthrough
CT: control target
= control target key end

     0   :  { %7 = vsyncpa [#allocation3], 0  ;;  %s367_s0 = inlined_call_operand.hbm [shape: f32[8,128], index: 0, kind: input, shape index: {}]   ;;  %s368_s1 = inlined_call_operand.hbm [shape: f32[8,128], index: 1, kind: input, shape index: {}]   ;;  %s369_s2 = inlined_call_operand.hbm [shape: s32[16,128], index: 2, kind: output, shape index: {}]  }
   0x1   :  { %8 = vsyncpa [#allocation6], 0 }
   0x2   :  { %9 = vsyncpa [#allocation4], 0  ;;  %s273_s9 = smov [#allocation2]   ;;  %s274_s11 = smov [#allocation5]  }
   0x3   :  { %s16_s10 = sshll.u32 %s273_s9, 4  ;;  %s26_s12 = sshll.u32 %s274_s11, 4  ;;  %s17_s10 = int_to_ptr.vmem [resolvable:$true] %s16_s10  ;;  %s27_s12 = int_to_ptr.vmem [resolvable:$true] %s26_s12 }
   0x4   :  { %s201_s15 = scalar_lea.hbm %s367_s0, 128 }
   0x5   :  { %p202_p0 = scmp.ne.s32.totalorder %s367_s0, %s201_s15  ;;  %p205_p1 = scmp.lt.u32.totalorder %s201_s15, %s367_s0 }
   0x7   :  { %p207_p2 = pnand %p205_p1, %p202_p0 }
   0x9   :  { %210 = shalt.err (!%p207_p2)
}
   0xa   :  { %s211_s20 = scalar_lea.vmem %s17_s10, 128  ;;  %p216_p4 = scmp.lt.s32.totalorder %s17_s10, %s17_s10 }
   0xb   :  { %p212_p3 = scmp.ne.s32.totalorder %s17_s10, %s211_s20  ;;  %p217_p5 = scmp.lt.s32.totalorder %s211_s20, %s211_s20 }
   0xd   :  { %p218_p6 = por %p217_p5, %p216_p4 }
   0xf   :  { %p219_p7 = pnand %p218_p6, %p212_p3 }
  0x11   :  { %222 = shalt.err (!%p219_p7)
}
  0x12   :  { %19 = dma.hbm_to_vmem [thread:$0]  %s367_s0, 128, %s17_s10, [#allocation3]  }
  0x13   :  { %s223_s25 = scalar_lea.hbm %s368_s1, 128 }
  0x14   :  { %p224_p8 = scmp.ne.s32.totalorder %s368_s1, %s223_s25  ;;  %p227_p9 = scmp.lt.u32.totalorder %s223_s25, %s368_s1 }
  0x16   :  { %p229_p10 = pnand %p227_p9, %p224_p8 }
  0x18   :  { %232 = shalt.err (!%p229_p10)
}
  0x19   :  { %s233_s30 = scalar_lea.vmem %s27_s12, 128  ;;  %p238_p12 = scmp.lt.s32.totalorder %s27_s12, %s27_s12 }
  0x1a   :  { %p234_p11 = scmp.ne.s32.totalorder %s27_s12, %s233_s30  ;;  %p239_p13 = scmp.lt.s32.totalorder %s233_s30, %s233_s30 }
  0x1c   :  { %p240_p0 = por %p239_p13, %p238_p12 }
  0x1e   :  { %p241_p1 = pnand %p240_p0, %p234_p11 }
  0x20   :  { %244 = shalt.err (!%p241_p1)
}
  0x21   :  { %29 = dma.hbm_to_vmem [thread:$0]  %s368_s1, 128, %s27_s12, [#allocation6]  }
  0x22   :  { %267 = dma.done.wait [#allocation3], 128  }
  0x23   :  { %268 = vsyncadd [#allocation3], 4294967168 }
  0x24   :  { %269 = dma.done.wait [#allocation6], 128  }
  0x25   :  { %270 = vsyncadd [#allocation6], 4294967168  ;;  %v275_v0 = vmov 0   ;;  %v36_v1 = vld [vmem:[#allocation2] sm:$0xff]  ;;  %v37_v2 = vld [vmem:[#allocation5] sm:$0xff]  ;;  %s276_s1 = smov [#allocation7]  }
  0x26   :  { %74 = vst [vmem:[#allocation7] sm:$0xff] %v275_v0  ;;  %75 = vst [vmem:[#allocation7 + $0x8] sm:$0xff] %v275_v0  ;;  %v38_v3 = vsub.f32 0.0, %v36_v1  ;;  %vm43_vm0 = vcmp.gt.f32.partialorder %v37_v2, 0.0  ;;  %s179_s4 = sshll.u32 %s276_s1, 4  ;;  %s180_s4 = int_to_ptr.vmem [resolvable:$true] %s179_s4 }
  0x27   :  { %v166_v4 = vsel %vm43_vm0, 1, %v275_v0  ;;  %s245_s5 = scalar_lea.vmem %s180_s4, 256  ;;  %p250_p3 = scmp.lt.s32.totalorder %s180_s4, %s180_s4 }
  0x28   :  { %v39_v5 = vmul.f32 1.442695, %v38_v3  ;;  %v167_v6 = vrot.slane %v166_v4, 4  ;;  %p246_p2 = scmp.ne.s32.totalorder %s180_s4, %s245_s5  ;;  %p251_p4 = scmp.lt.s32.totalorder %s245_s5, %s245_s5 }
  0x2a   :  { %199 = vpow2.f32 %v39_v5  ;;  %v168_v7 = vadd.s32 %v167_v6, %v166_v4  ;;  %p252_p5 = por %p251_p4, %p250_p3 }
  0x2c   :  { %v169_v8 = vrot.slane %v168_v7, 2  ;;  %p253_p6 = pnand %p252_p5, %p246_p2 }
  0x2e   :  { %v170_v9 = vadd.s32 %v169_v8, %v168_v7 }
  0x30   :  { %v171_v10 = vrot.slane %v170_v9, 1 }
  0x32   :  { %v172_v11 = vadd.s32 %v171_v10, %v170_v9 }
  0x34   :  { %v200_v12 = vpop.eup %199  ;;  %173 = vst [vmem:[#allocation7 + $0xa] sm:$0x1] %v172_v11 }
  0x35   :  { %v192_v13 = vadd.f32 -1.0, %v200_v12 }
  0x37   :  { %v42_v14 = vand.u32 2147483647, %v192_v13 }
  0x39   :  { %vm44_vm1 = vcmp.ge.f32.partialorder %v42_v14, 0.1  ;;  %vm46_vm2 = vcmp.ge.f32.partialorder %v42_v14, 0.2  ;;  %vm49_vm3 = vcmp.ge.f32.partialorder %v42_v14, 0.3 }
  0x3a   :  { %v45_v15 = vsel %vm44_vm1, 1, %v275_v0  ;;  %v47_v16 = vsel %vm46_vm2, 1, %v275_v0  ;;  %v50_v17 = vsel %vm49_vm3, 1, %v275_v0  ;;  %vm52_vm4 = vcmp.ge.f32.partialorder %v42_v14, 0.4 }
  0x3b   :  { %v48_v18 = vadd.s32 %v47_v16, %v45_v15  ;;  %vm55_vm5 = vcmp.ge.f32.partialorder %v42_v14, 0.5  ;;  %v53_v19 = vsel %vm52_vm4, 1, %v275_v0  ;;  %vm58_vm6 = vcmp.ge.f32.partialorder %v42_v14, 0.6 }
  0x3c   :  { %v56_v21 = vsel %vm55_vm5, 1, %v275_v0  ;;  %vm61_vm7 = vcmp.ge.f32.partialorder %v42_v14, 0.7  ;;  %v59_v23 = vsel %vm58_vm6, 1, %v275_v0  ;;  %vm64_vm8 = vcmp.ge.f32.partialorder %v42_v14, 0.8 }
  0x3d   :  { %v51_v20 = vadd.s32 %v50_v17, %v48_v18  ;;  %v62_v25 = vsel %vm61_vm7, 1, %v275_v0  ;;  %vm67_vm9 = vcmp.ge.f32.partialorder %v42_v14, 0.9  ;;  %v65_v27 = vsel %vm64_vm8, 1, %v275_v0 }
  0x3e   :  { %vm70_vm10 = vcmp.ge.f32.partialorder %v42_v14, 1.000001  ;;  %v68_v29 = vsel %vm67_vm9, 1, %v275_v0 }
  0x3f   :  { %v54_v22 = vadd.s32 %v53_v19, %v51_v20  ;;  %v71_v31 = vsel %vm70_vm10, 1, %v275_v0 }
  0x41   :  { %v57_v24 = vadd.s32 %v56_v21, %v54_v22 }
  0x43   :  { %v60_v26 = vadd.s32 %v59_v23, %v57_v24 }
  0x45   :  { %v63_v28 = vadd.s32 %v62_v25, %v60_v26 }
  0x47   :  { %v66_v30 = vadd.s32 %v65_v27, %v63_v28 }
  0x49   :  { %v69_v32 = vadd.s32 %v68_v29, %v66_v30 }
  0x4b   :  { %v72_v33 = vadd.s32 %v71_v31, %v69_v32 }
  0x4d   :  { %v333_v34 = vsel %vm43_vm0, %v72_v33, 10 }
  0x4e   :  { %vm76_vm11 = vcmp.eq.s32.totalorder %v333_v34, 0  ;;  %vm85_vm12 = vcmp.eq.s32.totalorder %v333_v34, 1  ;;  %vm94_vm13 = vcmp.eq.s32.totalorder %v333_v34, 2  ;;  %vm103_vm14 = vcmp.eq.s32.totalorder %v333_v34, 3 }
  0x4f   :  { %v77_v35 = vsel %vm76_vm11, 1, %v275_v0  ;;  %v86_v36 = vsel %vm85_vm12, 1, %v275_v0  ;;  %v95_v37 = vsel %vm94_vm13, 1, %v275_v0  ;;  %v104_v38 = vsel %vm103_vm14, 1, %v275_v0 }
  0x50   :  { %v78_v39 = vrot.slane %v77_v35, 4  ;;  %v87_v40 = vrot.slane %v86_v36, 4  ;;  %v96_v41 = vrot.slane %v95_v37, 4  ;;  %v105_v42 = vrot.slane %v104_v38, 4 }
  0x51   :  { %vm112_vm15 = vcmp.eq.s32.totalorder %v333_v34, 4  ;;  %vm121_vm0 = vcmp.eq.s32.totalorder %v333_v34, 5  ;;  %vm130_vm1 = vcmp.eq.s32.totalorder %v333_v34, 6  ;;  %vm139_vm2 = vcmp.eq.s32.totalorder %v333_v34, 7 }
  0x52   :  { %v79_v43 = vadd.s32 %v78_v39, %v77_v35  ;;  %v88_v44 = vadd.s32 %v87_v40, %v86_v36  ;;  %v97_v45 = vadd.s32 %v96_v41, %v95_v37  ;;  %v106_v46 = vadd.s32 %v105_v42, %v104_v38 }
  0x53   :  { %v113_v47 = vsel %vm112_vm15, 1, %v275_v0  ;;  %v122_v48 = vsel %vm121_vm0, 1, %v275_v0  ;;  %v131_v49 = vsel %vm130_vm1, 1, %v275_v0  ;;  %v140_v50 = vsel %vm139_vm2, 1, %v275_v0 }
  0x54   :  { %v80_v51 = vrot.slane %v79_v43, 2  ;;  %v89_v52 = vrot.slane %v88_v44, 2  ;;  %v98_v53 = vrot.slane %v97_v45, 2  ;;  %v107_v54 = vrot.slane %v106_v46, 2 }
  0x55   :  { %v114_v55 = vrot.slane %v113_v47, 4  ;;  %v123_v56 = vrot.slane %v122_v48, 4  ;;  %v132_v57 = vrot.slane %v131_v49, 4  ;;  %v141_v58 = vrot.slane %v140_v50, 4 }
  0x56   :  { %v81_v59 = vadd.s32 %v80_v51, %v79_v43  ;;  %v90_v60 = vadd.s32 %v89_v52, %v88_v44  ;;  %v99_v61 = vadd.s32 %v98_v53, %v97_v45  ;;  %v108_v62 = vadd.s32 %v107_v54, %v106_v46 }
  0x57   :  { %v115_v63 = vadd.s32 %v114_v55, %v113_v47  ;;  %v124_v1 = vadd.s32 %v123_v56, %v122_v48  ;;  %v133_v2 = vadd.s32 %v132_v57, %v131_v49  ;;  %v142_v3 = vadd.s32 %v141_v58, %v140_v50 }
  0x58   :  { %v82_v4 = vrot.slane %v81_v59, 1  ;;  %v91_v5 = vrot.slane %v90_v60, 1  ;;  %v100_v6 = vrot.slane %v99_v61, 1  ;;  %v109_v7 = vrot.slane %v108_v62, 1 }
  0x59   :  { %v116_v8 = vrot.slane %v115_v63, 2  ;;  %v125_v9 = vrot.slane %v124_v1, 2  ;;  %v134_v10 = vrot.slane %v133_v2, 2  ;;  %v143_v11 = vrot.slane %v142_v3, 2 }
  0x5a   :  { %v83_v12 = vadd.s32 %v82_v4, %v81_v59  ;;  %v92_v13 = vadd.s32 %v91_v5, %v90_v60  ;;  %v101_v14 = vadd.s32 %v100_v6, %v99_v61  ;;  %v110_v15 = vadd.s32 %v109_v7, %v108_v62 }
  0x5b   :  { %v117_v16 = vadd.s32 %v116_v8, %v115_v63  ;;  %v126_v17 = vadd.s32 %v125_v9, %v124_v1  ;;  %v135_v18 = vadd.s32 %v134_v10, %v133_v2  ;;  %v144_v19 = vadd.s32 %v143_v11, %v142_v3 }
  0x5c   :  { %84 = vst [vmem:[#allocation7] sm:$0x1] %v83_v12  ;;  %93 = vst [vmem:[#allocation7 + $0x1] sm:$0x1] %v92_v13  ;;  %vm148_vm3 = vcmp.eq.s32.totalorder %v333_v34, 8  ;;  %vm157_vm4 = vcmp.eq.s32.totalorder %v333_v34, 9 }
  0x5d   :  { %102 = vst [vmem:[#allocation7 + $0x2] sm:$0x1] %v101_v14  ;;  %111 = vst [vmem:[#allocation7 + $0x3] sm:$0x1] %v110_v15  ;;  %v118_v20 = vrot.slane %v117_v16, 1  ;;  %v127_v21 = vrot.slane %v126_v17, 1 }
  0x5e   :  { %v136_v22 = vrot.slane %v135_v18, 1  ;;  %v145_v23 = vrot.slane %v144_v19, 1  ;;  %v149_v24 = vsel %vm148_vm3, 1, %v275_v0  ;;  %v158_v25 = vsel %vm157_vm4, 1, %v275_v0 }
  0x5f   :  { %v119_v26 = vadd.s32 %v118_v20, %v117_v16  ;;  %v128_v27 = vadd.s32 %v127_v21, %v126_v17  ;;  %v150_v30 = vrot.slane %v149_v24, 4  ;;  %v159_v31 = vrot.slane %v158_v25, 4 }
  0x60   :  { %v137_v28 = vadd.s32 %v136_v22, %v135_v18  ;;  %v146_v29 = vadd.s32 %v145_v23, %v144_v19 }
  0x61   :  { %120 = vst [vmem:[#allocation7 + $0x4] sm:$0x1] %v119_v26  ;;  %129 = vst [vmem:[#allocation7 + $0x5] sm:$0x1] %v128_v27  ;;  %v151_v32 = vadd.s32 %v150_v30, %v149_v24  ;;  %v160_v33 = vadd.s32 %v159_v31, %v158_v25 }
  0x62   :  { %138 = vst [vmem:[#allocation7 + $0x6] sm:$0x1] %v137_v28  ;;  %147 = vst [vmem:[#allocation7 + $0x7] sm:$0x1] %v146_v29 }
  0x63   :  { %v152_v34 = vrot.slane %v151_v32, 2  ;;  %v161_v35 = vrot.slane %v160_v33, 2 }
  0x65   :  { %v153_v36 = vadd.s32 %v152_v34, %v151_v32  ;;  %v162_v37 = vadd.s32 %v161_v35, %v160_v33 }
  0x67   :  { %v154_v38 = vrot.slane %v153_v36, 1  ;;  %v163_v0 = vrot.slane %v162_v37, 1 }
  0x69   :  { %v155_v39 = vadd.s32 %v154_v38, %v153_v36  ;;  %v164_v40 = vadd.s32 %v163_v0, %v162_v37 }
  0x6b   :  { %156 = vst [vmem:[#allocation7 + $0x8] sm:$0x1] %v155_v39  ;;  %165 = vst [vmem:[#allocation7 + $0x9] sm:$0x1] %v164_v40 }
  0x6c   :  { %256 = shalt.err (!%p253_p6)
}
  0x6d   :  { %s257_s8 = scalar_lea.hbm %s369_s2, 256 }
  0x6e   :  { %p258_p7 = scmp.ne.s32.totalorder %s369_s2, %s257_s8  ;;  %p261_p8 = scmp.lt.u32.totalorder %s257_s8, %s369_s2 }
  0x70   :  { %p263_p9 = pnand %p261_p8, %p258_p7 }
  0x72   :  { %266 = shalt.err (!%p263_p9)
}
  0x73   :  { %s277_s13 = smov 128   ;;  %s278_s14 = smov 8  }
  0x74   :  { %185 = dma.vmem_to_hbm [thread:$0]  %s180_s4, 256, %s369_s2, [#allocation4], %s277_s13, %s277_s13, %s278_s14  }
  0x75   :  { %271 = dma.done.wait [#allocation4], 256  }
  0x76   :  { %272 = vsyncadd [#allocation4], 4294967040 }
  0x77   :  { %189 = vsyncpa [#allocation3], 1 }
  0x78   :  { %190 = vsyncpa [#allocation6], 1 }
  0x79   :  { %191 = vsyncpa [#allocation4], 1 }

</bundles_post_ra>
